<compile_context>
chip_gen: v7x
topology: tpu7x:2x2x1
jax: 0.10.0
libtpu: 0.0.40
codegen_flags: <defaults>
</compile_context>

<pallas_src>
from functools import partial

import jax
import jax.numpy as jnp
from jax import lax
from jax.experimental import pallas as pl
from jax.experimental.pallas import tpu as pltpu


def _init_aug_kernel(x_ref, w_ref, b_ref, o_ref):
    """out[:, :D] = x (exact copy); out[:, D:] = x @ W^T + b (HIGHEST precision)."""
    data_dim = x_ref.shape[-1]
    x = x_ref[...]
    # Exact pass-through of x0 (no MXU rounding, preserves -0.0).
    o_ref[:, :data_dim] = x.astype(o_ref.dtype)
    # Small fc matmul: (rows, D) @ (D, E) -> (rows, E).
    fc = (
        jnp.dot(
            x,
            w_ref[...],
            preferred_element_type=jnp.float32,
            precision=lax.Precision.HIGHEST,
        )
        + b_ref[...]
    )
    o_ref[:, data_dim:] = fc.astype(o_ref.dtype)


def make_init_aug_params(weight, bias):
    """Hoisted once (== module __init__): transpose weight, reshape bias.

    weight: (extra_dim, data_dim)  -- nn.Linear weight
    bias:   (extra_dim,)
    returns w_t (data_dim, extra_dim) f32, b_row (1, extra_dim) f32
    """
    w_t = jnp.asarray(weight, jnp.float32).T          # (D, E)
    b_row = jnp.asarray(bias, jnp.float32).reshape(1, -1)  # (1, E)
    return w_t, b_row


# ---------------------------------------------------------------------------
# Latency path: single row, gridless, full-array VMEM blocks.
# Takes (1, D) f32 and returns (1, D+E) f32 -- no wrapper-side reshape/astype.
# ---------------------------------------------------------------------------
@jax.jit
def init_aug_forward_row(x_row, w_t, b_row):
    data_dim, extra_dim = w_t.shape
    out_dim = data_dim + extra_dim
    return pl.pallas_call(
        _init_aug_kernel,
        out_shape=jax.ShapeDtypeStruct((1, out_dim), x_row.dtype),
        in_specs=[
            pl.BlockSpec(memory_space=pltpu.MemorySpace.VMEM),
            pl.BlockSpec(memory_space=pltpu.MemorySpace.VMEM),
            pl.BlockSpec(memory_space=pltpu.MemorySpace.VMEM),
        ],
        out_specs=pl.BlockSpec(memory_space=pltpu.MemorySpace.VMEM),
    )(x_row, w_t, b_row)


def init_aug_forward(x0, w_t, b_row):
    """Module-faithful API: 1-D x0 -> 1-D cat(x0, fc(x0)).

    Kept only for parity with the PyTorch forward; the reshape/squeeze here
    are extra XLA ops -- use init_aug_forward_row on the hot path.
    """
    data_dim = w_t.shape[0]
    return init_aug_forward_row(x0.reshape(1, data_dim), w_t, b_row)[0]


# ---------------------------------------------------------------------------
# Throughput path: (B, D) batch, grid over row tiles, weights VMEM-resident.
# ---------------------------------------------------------------------------
@partial(jax.jit, static_argnames=("tile_b",))
def init_aug_forward_batched(x, w_t, b_row, tile_b=512):
    B, data_dim = x.shape
    extra_dim = w_t.shape[1]
    out_dim = data_dim + extra_dim
    tile_b = min(tile_b, B)
    grid = (pl.cdiv(B, tile_b),)
    return pl.pallas_call(
        _init_aug_kernel,
        out_shape=jax.ShapeDtypeStruct((B, out_dim), x.dtype),
        grid_spec=pltpu.PrefetchScalarGridSpec(
            num_scalar_prefetch=0,
            grid=grid,
            in_specs=[
                pl.BlockSpec((tile_b, data_dim), lambda i: (i, 0)),
                # Constant index_maps: W^T and bias stay VMEM-resident,
                # DMA'd once instead of once per grid step.
                pl.BlockSpec((data_dim, extra_dim), lambda i: (0, 0)),
                pl.BlockSpec((1, extra_dim), lambda i: (0, 0)),
            ],
            out_specs=pl.BlockSpec((tile_b, out_dim), lambda i: (i, 0)),
        ),
        compiler_params=pltpu.CompilerParams(
            dimension_semantics=("parallel",),  # shards batch across TCs on v7x
        ),
    )(x, w_t, b_row)


if __name__ == "__main__":
    data_dim = 28   # state dimension ("cutoff" in the original experiment)
    extra_dim = 4   # augmented dimensions
    batch = 1024    # throughput-path demo batch (2 grid steps of 512 rows)

    key = jax.random.PRNGKey(0)
    k_w, k_b, k_x, k_xb = jax.random.split(key, 4)

    # nn.Linear(data_dim, extra_dim) default init: U(-1/sqrt(fan_in), +1/sqrt(fan_in)).
    bound = 1.0 / jnp.sqrt(jnp.float32(data_dim))
    weight = jax.random.uniform(k_w, (extra_dim, data_dim), jnp.float32, -bound, bound)
    bias = jax.random.uniform(k_b, (extra_dim,), jnp.float32, -bound, bound)

    # Inputs.
    x0 = jax.random.normal(k_x, (data_dim,), dtype=jnp.float32)
    x_batch = jax.random.normal(k_xb, (batch, data_dim), dtype=jnp.float32)

    # Parameter prep happens once, outside the hot path (== module __init__).
    w_t, b_row = make_init_aug_params(weight, bias)

    # ---- latency path (module forward: single vector) ----
    out = init_aug_forward(x0, w_t, b_row)
    out = jax.block_until_ready(out)

    ref_fc = jnp.dot(x0, weight.T, precision=lax.Precision.HIGHEST) + bias
    ref = jnp.concatenate((x0, ref_fc))
    assert out.shape == (data_dim + extra_dim,)
    # Pass-through half must be bit-exact (plain copy, not routed through MXU).
    assert bool(jnp.array_equal(out[:data_dim], x0)), "pass-through not exact"
    assert jnp.allclose(out, ref, atol=1e-5, rtol=1e-5), (out, ref)

    # ---- throughput path (batched) ----
    out_b = init_aug_forward_batched(x_batch, w_t, b_row, tile_b=512)
    out_b = jax.block_until_ready(out_b)

    ref_fc_b = (
        jnp.dot(x_batch, weight.T, precision=lax.Precision.HIGHEST) + bias[None, :]
    )
    ref_b = jnp.concatenate((x_batch, ref_fc_b), axis=1)
    assert out_b.shape == (batch, data_dim + extra_dim)
    assert bool(jnp.array_equal(out_b[:, :data_dim], x_batch)), "batched pass-through not exact"
    assert jnp.allclose(out_b, ref_b, atol=1e-5, rtol=1e-5)

    print("KERNEL_OK")
</pallas_src>

<mosaic_0001>
module attributes {stable_mosaic.version = 11 : i64} {
  func.func @_init_aug_kernel(%arg0: memref<1x28xf32, #tpu.memory_space<vmem>>, %arg1: memref<28x4xf32, #tpu.memory_space<vmem>>, %arg2: memref<1x4xf32, #tpu.memory_space<vmem>>, %arg3: memref<1x32xf32, #tpu.memory_space<vmem>>) attributes {dimension_semantics = [], scalar_prefetch = 0 : i64, scratch_operands = 0 : i64, tpu.core_type = #tpu.core_type<tc>} {
    %c0 = arith.constant 0 : index
    %c0_0 = arith.constant 0 : index
    %0 = vector.load %arg0[%c0, %c0_0] : memref<1x28xf32, #tpu.memory_space<vmem>>, vector<1x28xf32>
    %c0_1 = arith.constant 0 : index
    %c0_2 = arith.constant 0 : index
    %1 = vector.load %arg3[%c0_1, %c0_2] : memref<1x32xf32, #tpu.memory_space<vmem>>, vector<1x28xf32>
    tpu.vector_store %arg3[%c0_1, %c0_2], %0 {strides = array<i32>} : memref<1x32xf32, #tpu.memory_space<vmem>>, vector<1x28xf32>,
    %c0_3 = arith.constant 0 : index
    %c0_4 = arith.constant 0 : index
    %2 = vector.load %arg1[%c0_3, %c0_4] : memref<28x4xf32, #tpu.memory_space<vmem>>, vector<28x4xf32>
    %cst = arith.constant dense<0.000000e+00> : vector<1x4xf32>
    %3 = tpu.matmul %0, %2, %cst {dimension_numbers = #tpu.dot_dimension_numbers<[1], [0], [0], [1], [0, 0, 1, 1], [], []>, precision = #tpu.contract_precision<fp32>} : vector<1x28xf32>, vector<28x4xf32>, vector<1x4xf32> -> vector<1x4xf32>
    %c0_5 = arith.constant 0 : index
    %c0_6 = arith.constant 0 : index
    %4 = vector.load %arg2[%c0_5, %c0_6] : memref<1x4xf32, #tpu.memory_space<vmem>>, vector<1x4xf32>
    %5 = arith.addf %3, %4 : vector<1x4xf32>
    %c0_7 = arith.constant 0 : index
    %c28 = arith.constant 28 : index
    %6 = vector.load %arg3[%c0_7, %c28] : memref<1x32xf32, #tpu.memory_space<vmem>>, vector<1x4xf32>
    tpu.vector_store %arg3[%c0_7, %c28], %5 {strides = array<i32>} : memref<1x32xf32, #tpu.memory_space<vmem>>, vector<1x4xf32>,
    return
  }
}

</mosaic_0001>

<bundles_post_ra>
// kernel: init_aug_forward_row.1
= control target key start
LH: loop header
LB: loop body
LE: loop exit
PB: predicated region body
PF: predicated region fallthrough
CT: control target
= control target key end

     0   :  { %vm27_vm0 = vcmask 1043456   ;;  %v707_v3 = vmov 0.0|0.0   ;;  %vm708_vm1 = vmmov 0   ;;  %v709_v9 = vmov 0.0   ;;  %s790_s0 = inlined_call_operand.vmem [shape: f32[1,28], index: 0, kind: input, shape index: {}]   ;;  %s791_s1 = inlined_call_operand.vmem [shape: f32[28,4], index: 1, kind: input, shape index: {}]   ;;  %s792_s2 = inlined_call_operand.vmem [shape: f32[1,4], index: 2, kind: input, shape index: {}]   ;;  %s793_s3 = inlined_call_operand.hbm [shape: f32[1,32], index: 3, kind: output, shape index: {}]  }
   0x1   :  { %v18_v0 = vld [vmem:[%s791_s1] sm:$0xff]  ;;  %v19_v1 = vld [vmem:[%s791_s1 + $0x8] sm:$0xff]  ;;  %v20_v2 = vld [vmem:[%s791_s1 + $0x10] sm:$0xff]  ;;  %632 = vmatprep.subr.bf16.mxu1 %v707_v3  ;;  %650 = vmatprep.subr.bf16.mxu0 %v707_v3  ;;  %vm23_vm2 = vcmask 228352  }
   0x2   :  { %v32_v4 = vand.u32 4294901760, %v18_v0  ;;  %v35_v5 = vand.u32 4294901760, %v19_v1  ;;  %v21_v6 = vld [vmem:[%s791_s1 + $0x18] sm:$0xf]  ;;  %v38_v7 = vand.u32 4294901760, %v20_v2  ;;  %574 = vmatprep.mubr.msk.f32.mxu1 %vm708_vm1, %v709_v9  ;;  %607 = vmatprep.mubr.msk.f32.mxu0 %vm708_vm1, %v709_v9 }
   0x3   :  { %v29_v8 = vsel %vm27_vm0, %v21_v6, 0  ;;  %v753_v10 = vld [vmem:[%s790_s0] sm:$0x1] }
   0x4   :  { %v633_v11 = vpack.c.bf16 %v35_v5, %v32_v4  ;;  %v112_v12 = vsub.f32 %v18_v0, %v32_v4  ;;  %v119_v13 = vsub.f32 %v19_v1, %v35_v5  ;;  %v41_v14 = vand.u32 4294901760, %v29_v8 }
   0x5   :  { %8 = vsyncpa [#allocation3], 0  ;;  %v126_v15 = vsub.f32 %v20_v2, %v38_v7  ;;  %v25_v16 = vsel %vm23_vm2, %v753_v10, 0  ;;  %vm16_vm3 = vcmask 221184   ;;  %v22_v43 = vld [vmem:[%s792_s2] sm:$0x1] }
   0x6   :  { %634 = vmatpush3.bf16.msra.mxu1 %v633_v11  ;;  %652 = vmatpush3.bf16.msra.mxu0 %v633_v11  ;;  %v636_v17 = vpack.c.bf16 %v41_v14, %v38_v7  ;;  %v133_v18 = vsub.f32 %v29_v8, %v41_v14  ;;  %v100_v19 = vand.u32 4294901760, %v25_v16  ;;  %v113_v20 = vand.u32 4294901760, %v112_v12  ;;  %17 = vst.msk [vmem:[#allocation2] sm:$0x1] %vm16_vm3, %v753_v10  ;;  %s710_s22 = smov 28   ;;  %s711_s23 = smov [#allocation2]  }
   0x7   :  { %635 = vmatprep.subr.bf16.mxu1 %v707_v3  ;;  %653 = vmatprep.subr.bf16.mxu0 %v707_v3  ;;  %v120_v21 = vand.u32 4294901760, %v119_v13  ;;  %v127_v22 = vand.u32 4294901760, %v126_v15  ;;  %v645_v40 = vpack.c.bf16 %v119_v13, %v112_v12  ;;  %s528_s24 = sshll.u32 %s711_s23, 4  ;;  %vm520_vm4 = vcmask 254176   ;;  %s529_s24 = int_to_ptr.vmem [resolvable:$true] %s528_s24 }
   0x8   :  { %v101_v23 = vsub.f32 %v25_v16, %v100_v19  ;;  %v114_v24 = vsub.f32 %v112_v12, %v113_v20  ;;  %v134_v25 = vand.u32 4294901760, %v133_v18  ;;  %v648_v41 = vpack.c.bf16 %v133_v18, %v126_v15  ;;  %s683_s25 = scalar_lea.vmem %s529_s24, 16  ;;  %s687_s26 = scalar_lea.vmem %s529_s24, 32 }
   0x9   :  { %v121_v26 = vsub.f32 %v119_v13, %v120_v21  ;;  %v128_v27 = vsub.f32 %v126_v15, %v127_v22  ;;  %v657_v30 = vpack.c.bf16 %v120_v21, %v113_v20  ;;  %p684_p0 = scmp.ne.s32.totalorder %s529_s24, %s683_s25  ;;  %p688_p1 = scmp.lt.s32.totalorder %s529_s24, %s529_s24 }
   0xa   :  { %637 = vmatpush3.bf16.msra.mxu1 %v636_v17  ;;  %655 = vmatpush3.bf16.msra.mxu0 %v636_v17  ;;  %v102_v28 = vand.u32 4294901760, %v101_v23  ;;  %v115_v29 = vand.u32 4294901760, %v114_v24  ;;  %v135_v31 = vsub.f32 %v133_v18, %v134_v25  ;;  %v660_v38 = vpack.c.bf16 %v134_v25, %v127_v22  ;;  %p689_p2 = scmp.lt.s32.totalorder %s687_s26, %s683_s25 }
   0xb   :  { %638 = vmatprep.subr.bf16.mxu1 %v707_v3  ;;  %656 = vmatprep.subr.bf16.mxu0 %v707_v3  ;;  %v122_v32 = vand.u32 4294901760, %v121_v26  ;;  %v129_v35 = vand.u32 4294901760, %v128_v27 }
   0xc   :  { %v103_v33 = vsub.f32 %v101_v23, %v102_v28  ;;  %v136_v36 = vand.u32 4294901760, %v135_v31  ;;  %p690_p3 = por %p689_p2, %p688_p1 }
   0xd   :  { %608 = vmatmul.mubr.f32.vlgmr.msra.gmra.mrb[0].mxu0 %v102_v28  ;;  %v639_v34 = vpack.c.bf16 %v122_v32, %v115_v29 }
   0xe   :  { %v104_v37 = vand.u32 4294901760, %v103_v33  ;;  %658 = vmatpush3.bf16.msra.mxu0 %v657_v30  ;;  %618 = vmatprep.mubr.msk.f32.mxu0 %vm708_vm1, %v709_v9  ;;  %v642_v39 = vpack.c.bf16 %v136_v36, %v129_v35  ;;  %p691_p4 = pnand %p690_p3, %p684_p0 }
   0xf   :  { %659 = vmatprep.subr.bf16.mxu0 %v707_v3 }
  0x10   :  { %575 = vmatmul.mubr.f32.vlgmr.msra.gmra.mrb[0].mxu1 %v104_v37 }
  0x11   :  { %640 = vmatpush3.bf16.msra.mxu1 %v639_v34  ;;  %585 = vmatprep.mubr.msk.f32.mxu1 %vm708_vm1, %v709_v9 }
  0x12   :  { %641 = vmatprep.subr.bf16.mxu1 %v707_v3  ;;  %661 = vmatpush3.bf16.msra.mxu0 %v660_v38 }
  0x13   :  { %662 = vmatprep.subr.bf16.mxu0 %v707_v3 }
  0x15   :  { %643 = vmatpush3.bf16.msra.mxu1 %v642_v39  ;;  %619 = vmatmul.mubr.f32.vlgmr.msra.gmra.mrb[0].mxu0 %v100_v19 }
  0x16   :  { %644 = vmatprep.subr.bf16.mxu1 %v707_v3  ;;  %664 = vmatpush3.bf16.msra.mxu0 %v633_v11 }
  0x17   :  { %665 = vmatprep.subr.bf16.mxu0 %v707_v3  ;;  %629 = vmatprep.mubr.msk.f32.mxu0 %vm708_vm1, %v709_v9 }
  0x18   :  { %586 = vmatmul.mubr.f32.vlgmr.msra.gmra.mrb[0].mxu1 %v100_v19 }
  0x19   :  { %646 = vmatpush3.bf16.msra.mxu1 %v645_v40  ;;  %596 = vmatprep.mubr.msk.f32.mxu1 %vm708_vm1, %v709_v9 }
  0x1a   :  { %647 = vmatprep.subr.bf16.mxu1 %v707_v3  ;;  %667 = vmatpush3.bf16.msra.mxu0 %v636_v17 }
  0x1d   :  { %649 = vmatpush3.bf16.msra.mxu1 %v648_v41  ;;  %630 = vmatmul.mubr.f32.vlgmr.msra.gmra.mrb[0].mxu0 %v100_v19 }
  0x20   :  { %597 = vmatmul.mubr.f32.vlgmr.msra.gmra.mrb[0].mxu1 %v101_v23 }
  0xf0   :  { %v512_v42 = vpop.f32.mrb[0].mxu0 }
  0xf1   :  { %v631_v44 = vpop.f32.mrb[1].mxu0 }
  0xf3   :  { %v277_v45 = vpop.f32.mrb[0].mxu1 }
  0xf4   :  { %v668_v46 = vadd.f32 %v277_v45, %v22_v43  ;;  %v598_v47 = vpop.f32.mrb[1].mxu1 }
  0xf6   :  { %v669_v48 = vadd.f32 %v668_v46, %v512_v42 }
  0xf8   :  { %517 = vrot.lane.b32.xlu0 %v669_v48, %s710_s22 }
 0x16a   :  { %v518_v49 = vpop.permute.xlu0 %517 }
 0x16b   :  { %521 = vst.msk [vmem:[#allocation2] sm:$0x1] %vm520_vm4, %v518_v49 }
 0x16c   :  { %694 = shalt.err (!%p691_p4)
}
 0x16d   :  { %s695_s28 = scalar_lea.hbm %s793_s3, 16 }
 0x16e   :  { %p696_p5 = scmp.ne.s32.totalorder %s793_s3, %s695_s28  ;;  %p699_p6 = scmp.lt.u32.totalorder %s695_s28, %s793_s3 }
 0x170   :  { %p701_p7 = pnand %p699_p6, %p696_p5 }
 0x172   :  { %704 = shalt.err (!%p701_p7)
}
 0x173   :  { %531 = dma.vmem_to_hbm [thread:$0]  %s529_s24, 16, %s793_s3, [#allocation3]  }
 0x174   :  { %705 = dma.done.wait [#allocation3], 16  }
 0x175   :  { %706 = vsyncadd [#allocation3], 4294967280 }
 0x176   :  { %535 = vsyncpa [#allocation3], 1 }

</bundles_post_ra>
